<compile_context>
chip_gen: v6e
topology: v6e:2x2x1
jax: 0.10.0
libtpu: 0.0.40
codegen_flags: <defaults>
</compile_context>

<pallas_src>
import functools

import jax
import jax.numpy as jnp
from jax.experimental import pallas as pl
from jax.experimental.pallas import tpu as pltpu

H1, H2, H3 = 128, 256, 64  # hidden widths of fc1 / fc2 / fc3


def _round_up(x, m):
    return ((x + m - 1) // m) * m


def _default_num_cores():
    """Best-effort TensorCore count (2 on v7x, else 1)."""
    try:
        kind = jax.devices()[0].device_kind.lower()
    except Exception:
        return 1
    return 2 if "v7" in kind else 1


def critic_kernel(x_ref, w1_ref, w2_ref, w3_ref, w5_ref, b_ref, o_ref):
    cdt = w1_ref.dtype  # compute dtype (bf16 production path, f32 for tests)

    # Packed bias column: static, sublane-aligned slices.
    b1 = b_ref[0:H1, :]                            # (128, 1) f32
    b2 = b_ref[H1:H1 + H2, :]                      # (256, 1)
    b3 = b_ref[H1 + H2:H1 + H2 + H3, :]            # (64, 1)
    b5 = b_ref[H1 + H2 + H3:H1 + H2 + H3 + 1, :]   # (1, 1)

    # fc1 + relu  (concat already folded into the packed, feature-major x).
    h1 = jnp.dot(w1_ref[...], x_ref[...],
                 preferred_element_type=jnp.float32) + b1
    h1 = jnp.maximum(h1, 0.0)
    # dropout1: identity (eval mode)

    # fc2 + relu
    h2 = jnp.dot(w2_ref[...], h1.astype(cdt),
                 preferred_element_type=jnp.float32) + b2
    h2 = jnp.maximum(h2, 0.0)
    # dropout2: identity (eval mode)

    # fc3 + relu
    h3 = jnp.dot(w3_ref[...], h2.astype(cdt),
                 preferred_element_type=jnp.float32) + b3
    h3 = jnp.maximum(h3, 0.0)

    # fc5: 64 -> 1.  A 1-row MXU matmul is wasteful; broadcast-multiply by the
    # (64,1) weight column and reduce over sublanes on the VPU/XLU.  The result
    # is already a lane-dense (1, tm) row, so the store is an unmasked vst.
    out = jnp.sum(h3 * w5_ref[...].astype(jnp.float32),
                  axis=0, keepdims=True) + b5
    o_ref[...] = out.astype(o_ref.dtype)


@functools.partial(jax.jit, static_argnames=("tile_m", "cores"))
def critic_forward(state, action, params, *, tile_m=1024, cores=None):
    """state: (B, S), action: (B, A); returns (B, 1) float32.

    tile_m: max batch columns per grid step (rounded to a multiple of 128).
    cores:  TensorCore count for grid splitting (auto-detected if None).
    """
    w1t, w2t, w3t, w5c, b_all = params
    cdt = w1t.dtype
    B, S = state.shape
    A = action.shape[1]
    ncores = _default_num_cores() if cores is None else int(cores)

    # Batch tile: always a multiple of 128 (lane width / v5e MXU granule), at
    # most tile_m, and capped at ceil(B / ncores) so a multi-TC chip (v7x)
    # gets at least one grid step per core on large batches.
    tm_cap = max(_round_up(int(tile_m), 128), 128)
    if ncores > 1 and B >= ncores * 128:
        tm = min(tm_cap, _round_up(pl.cdiv(B, ncores), 128))
    else:
        tm = min(tm_cap, _round_up(max(B, 1), 128))
    Bp = _round_up(B, tm)
    grid = (Bp // tm,)

    # One packed, feature-major input: concat + pad + transpose fuse into a
    # single tiny copy on the XLA side (the only host-side data prep).
    xT = jnp.concatenate([state.astype(cdt).T, action.astype(cdt).T], axis=0)
    if Bp != B:
        xT = jnp.pad(xT, ((0, 0), (0, Bp - B)))            # (S+A, Bp)

    def resident(arr):
        # Constant block index -> fetched once, stays VMEM-resident across grid.
        return pl.BlockSpec(arr.shape, lambda i: (0, 0))

    flops = 2 * Bp * ((S + A) * H1 + H1 * H2 + H2 * H3 + H3)
    bytes_accessed = (xT.size * xT.dtype.itemsize
                      + sum(int(p.size) * p.dtype.itemsize for p in params)
                      + Bp * 4)

    out = pl.pallas_call(
        critic_kernel,
        out_shape=jax.ShapeDtypeStruct((1, Bp), jnp.float32),
        grid=grid,
        in_specs=[
            pl.BlockSpec((S + A, tm), lambda i: (0, i)),    # batch tiled on lanes
            resident(w1t), resident(w2t), resident(w3t),
            resident(w5c), resident(b_all),
        ],
        out_specs=pl.BlockSpec((1, tm), lambda i: (0, i)),  # lane-dense output
        compiler_params=pltpu.CompilerParams(
            dimension_semantics=("parallel",)),             # both TCs on v7x
        cost_estimate=pl.CostEstimate(
            flops=flops, transcendentals=0, bytes_accessed=bytes_accessed),
    )(xT, w1t, w2t, w3t, w5c, b_all)

    return out.reshape(Bp, 1)[:B]


def init_critic_params(key, state_dim, action_dim, dtype=jnp.bfloat16):
    """Mirrors the PyTorch module's shapes/init.

    Weights keep PyTorch's (out_features, in_features) orientation because the
    kernel is feature-major (computes W @ x^T).  fc1/fc2/fc3: orthogonal
    weights, zero bias.  fc5: PyTorch-default uniform.  All biases are packed
    into one float32 column (added post-accumulation in f32).
    """
    sa = state_dim + action_dim
    k1, k2, k3, k5w, k5b = jax.random.split(key, 5)
    orth = jax.nn.initializers.orthogonal()
    w1t = orth(k1, (H1, sa), jnp.float32).astype(dtype)    # (128, S+A)
    w2t = orth(k2, (H2, H1), jnp.float32).astype(dtype)    # (256, 128)
    w3t = orth(k3, (H3, H2), jnp.float32).astype(dtype)    # (64, 256)
    bound5 = 1.0 / (H3 ** 0.5)
    w5c = jax.random.uniform(k5w, (H3, 1), jnp.float32,
                             -bound5, bound5).astype(dtype)  # (64, 1)
    b5 = jax.random.uniform(k5b, (1, 1), jnp.float32, -bound5, bound5)
    b_all = jnp.concatenate(
        [jnp.zeros((H1 + H2 + H3, 1), jnp.float32), b5], axis=0)  # (449, 1)
    return (w1t, w2t, w3t, w5c, b_all)


def critic_reference(state, action, params):
    """Pure-JAX reference mirroring the kernel's dtype handling."""
    w1t, w2t, w3t, w5c, b_all = params
    cdt = w1t.dtype
    f32 = jnp.float32
    hi = jax.lax.Precision.HIGHEST
    b1 = b_all[0:H1, 0]
    b2 = b_all[H1:H1 + H2, 0]
    b3 = b_all[H1 + H2:H1 + H2 + H3, 0]
    b5 = b_all[H1 + H2 + H3:, 0]
    x = jnp.concatenate([state, action], axis=1).astype(cdt).astype(f32)
    h1 = jnp.maximum(jnp.dot(x, w1t.astype(f32).T, precision=hi) + b1, 0.0)
    h2 = jnp.maximum(jnp.dot(h1.astype(cdt).astype(f32), w2t.astype(f32).T,
                             precision=hi) + b2, 0.0)
    h3 = jnp.maximum(jnp.dot(h2.astype(cdt).astype(f32), w3t.astype(f32).T,
                             precision=hi) + b3, 0.0)
    return jnp.dot(h3, w5c.astype(f32), precision=hi) + b5


if __name__ == "__main__":
    key = jax.random.PRNGKey(0)
    k_state, k_action, k_params = jax.random.split(key, 3)

    batch, state_dim, action_dim = 8, 24, 8

    state = jax.random.normal(k_state, (batch, state_dim), jnp.float32)
    action = jax.random.normal(k_action, (batch, action_dim), jnp.float32)

    # --- bf16 weights/activations, f32 accumulation (production path) ---
    params_bf16 = init_critic_params(k_params, state_dim, action_dim,
                                     dtype=jnp.bfloat16)
    out = jax.block_until_ready(critic_forward(state, action, params_bf16))
    ref = critic_reference(state, action, params_bf16)
    assert out.shape == (batch, 1), out.shape
    assert jnp.allclose(out, ref, atol=1e-2, rtol=1e-2), (out, ref)

    # --- f32 path (test-only), tight tolerance: validates kernel structure ---
    params_f32 = init_critic_params(k_params, state_dim, action_dim,
                                    dtype=jnp.float32)
    out32 = jax.block_until_ready(critic_forward(state, action, params_f32))
    ref32 = critic_reference(state, action, params_f32)
    assert jnp.allclose(out32, ref32, atol=1e-4, rtol=1e-4), (out32, ref32)

    # --- multi-step grid + ragged-batch (padded partial tile) path ---
    big_batch = 300
    ks2, ka2 = jax.random.split(jax.random.PRNGKey(1))
    state2 = jax.random.normal(ks2, (big_batch, state_dim), jnp.float32)
    action2 = jax.random.normal(ka2, (big_batch, action_dim), jnp.float32)
    out2 = jax.block_until_ready(
        critic_forward(state2, action2, params_bf16, tile_m=128))
    ref2 = critic_reference(state2, action2, params_bf16)
    assert out2.shape == (big_batch, 1), out2.shape
    assert jnp.allclose(out2, ref2, atol=1e-2, rtol=1e-2), (out2, ref2)

    # --- v7x-style 2-core tile selection branch (works on any chip) ---
    out3 = jax.block_until_ready(
        critic_forward(state2, action2, params_bf16, cores=2))
    assert jnp.allclose(out3, ref2, atol=1e-2, rtol=1e-2), (out3, ref2)

    print("KERNEL_OK")
</pallas_src>

<mosaic_0001>
module attributes {stable_mosaic.version = 11 : i64} {
  func.func @critic_kernel(%arg0: i32, %arg1: memref<32x128xbf16, #tpu.memory_space<vmem>>, %arg2: memref<128x32xbf16, #tpu.memory_space<vmem>>, %arg3: memref<256x128xbf16, #tpu.memory_space<vmem>>, %arg4: memref<64x256xbf16, #tpu.memory_space<vmem>>, %arg5: memref<64x1xbf16, #tpu.memory_space<vmem>>, %arg6: memref<449x1xf32, #tpu.memory_space<vmem>>, %arg7: memref<1x128xf32, #tpu.memory_space<vmem>>) attributes {dimension_semantics = [#tpu.dimension_semantics<parallel>], iteration_bounds = array<i64: 1>, scalar_prefetch = 0 : i64, scratch_operands = 0 : i64, tpu.core_type = #tpu.core_type<tc>, window_params = [{transform_indices = @transform_0, window_bounds = array<i64: 32, 128>}, {pipeline_mode = #tpu.pipeline_mode<synchronous>, transform_indices = @transform_1, window_bounds = array<i64: 128, 32>}, {pipeline_mode = #tpu.pipeline_mode<synchronous>, transform_indices = @transform_2, window_bounds = array<i64: 256, 128>}, {pipeline_mode = #tpu.pipeline_mode<synchronous>, transform_indices = @transform_3, window_bounds = array<i64: 64, 256>}, {pipeline_mode = #tpu.pipeline_mode<synchronous>, transform_indices = @transform_4, window_bounds = array<i64: 64, 1>}, {pipeline_mode = #tpu.pipeline_mode<synchronous>, transform_indices = @transform_5, window_bounds = array<i64: 449, 1>}, {transform_indices = @transform_6, window_bounds = array<i64: 1, 128>}]} {
    %c0 = arith.constant 0 : index
    %c0_0 = arith.constant 0 : index
    %0 = vector.load %arg6[%c0, %c0_0] : memref<449x1xf32, #tpu.memory_space<vmem>>, vector<128x1xf32>
    %c128 = arith.constant 128 : index
    %c0_1 = arith.constant 0 : index
    %1 = vector.load %arg6[%c128, %c0_1] : memref<449x1xf32, #tpu.memory_space<vmem>>, vector<256x1xf32>
    %c384 = arith.constant 384 : index
    %c0_2 = arith.constant 0 : index
    %2 = vector.load %arg6[%c384, %c0_2] : memref<449x1xf32, #tpu.memory_space<vmem>>, vector<64x1xf32>
    %c448 = arith.constant 448 : index
    %c0_3 = arith.constant 0 : index
    %3 = vector.load %arg6[%c448, %c0_3] : memref<449x1xf32, #tpu.memory_space<vmem>>, vector<1x1xf32>
    %c0_4 = arith.constant 0 : index
    %c0_5 = arith.constant 0 : index
    %4 = vector.load %arg2[%c0_4, %c0_5] : memref<128x32xbf16, #tpu.memory_space<vmem>>, vector<128x32xbf16>
    %c0_6 = arith.constant 0 : index
    %c0_7 = arith.constant 0 : index
    %5 = vector.load %arg1[%c0_6, %c0_7] : memref<32x128xbf16, #tpu.memory_space<vmem>>, vector<32x128xbf16>
    %cst = arith.constant dense<0.000000e+00> : vector<128x128xf32>
    %6 = tpu.matmul %4, %5, %cst {dimension_numbers = #tpu.dot_dimension_numbers<[1], [0], [0], [1], [0, 0, 1, 1], [], []>} : vector<128x32xbf16>, vector<32x128xbf16>, vector<128x128xf32> -> vector<128x128xf32>
    %7 = vector.broadcast %0 : vector<128x1xf32> to vector<128x128xf32>
    %8 = arith.addf %6, %7 : vector<128x128xf32>
    %cst_8 = arith.constant 0.000000e+00 : f32
    %9 = vector.broadcast %cst_8 : f32 to vector<128x128xf32>
    %10 = arith.maximumf %8, %9 : vector<128x128xf32>
    %c0_9 = arith.constant 0 : index
    %c0_10 = arith.constant 0 : index
    %11 = vector.load %arg3[%c0_9, %c0_10] : memref<256x128xbf16, #tpu.memory_space<vmem>>, vector<256x128xbf16>
    %12 = arith.truncf %10 : vector<128x128xf32> to vector<128x128xbf16>
    %cst_11 = arith.constant dense<0.000000e+00> : vector<256x128xf32>
    %13 = tpu.matmul %11, %12, %cst_11 {dimension_numbers = #tpu.dot_dimension_numbers<[1], [0], [0], [1], [0, 0, 1, 1], [], []>} : vector<256x128xbf16>, vector<128x128xbf16>, vector<256x128xf32> -> vector<256x128xf32>
    %14 = vector.broadcast %1 : vector<256x1xf32> to vector<256x128xf32>
    %15 = arith.addf %13, %14 : vector<256x128xf32>
    %cst_12 = arith.constant 0.000000e+00 : f32
    %16 = vector.broadcast %cst_12 : f32 to vector<256x128xf32>
    %17 = arith.maximumf %15, %16 : vector<256x128xf32>
    %c0_13 = arith.constant 0 : index
    %c0_14 = arith.constant 0 : index
    %18 = vector.load %arg4[%c0_13, %c0_14] : memref<64x256xbf16, #tpu.memory_space<vmem>>, vector<64x256xbf16>
    %19 = arith.truncf %17 : vector<256x128xf32> to vector<256x128xbf16>
    %cst_15 = arith.constant dense<0.000000e+00> : vector<64x128xf32>
    %20 = tpu.matmul %18, %19, %cst_15 {dimension_numbers = #tpu.dot_dimension_numbers<[1], [0], [0], [1], [0, 0, 1, 1], [], []>} : vector<64x256xbf16>, vector<256x128xbf16>, vector<64x128xf32> -> vector<64x128xf32>
    %21 = vector.broadcast %2 : vector<64x1xf32> to vector<64x128xf32>
    %22 = arith.addf %20, %21 : vector<64x128xf32>
    %cst_16 = arith.constant 0.000000e+00 : f32
    %23 = vector.broadcast %cst_16 : f32 to vector<64x128xf32>
    %24 = arith.maximumf %22, %23 : vector<64x128xf32>
    %c0_17 = arith.constant 0 : index
    %c0_18 = arith.constant 0 : index
    %25 = vector.load %arg5[%c0_17, %c0_18] : memref<64x1xbf16, #tpu.memory_space<vmem>>, vector<64x1xbf16>
    %26 = arith.extf %25 : vector<64x1xbf16> to vector<64x1xf32>
    %27 = vector.broadcast %26 : vector<64x1xf32> to vector<64x128xf32>
    %28 = arith.mulf %24, %27 : vector<64x128xf32>
    %cst_19 = arith.constant dense<0.000000e+00> : vector<128xf32>
    %29 = vector.multi_reduction <add>, %28, %cst_19 [0] : vector<64x128xf32> to vector<128xf32>
    %30 = vector.shape_cast %29 : vector<128xf32> to vector<1x128xf32>
    %31 = vector.broadcast %3 : vector<1x1xf32> to vector<1x128xf32>
    %32 = arith.addf %30, %31 : vector<1x128xf32>
    %c0_20 = arith.constant 0 : index
    %c0_21 = arith.constant 0 : index
    %33 = vector.load %arg7[%c0_20, %c0_21] : memref<1x128xf32, #tpu.memory_space<vmem>>, vector<1x128xf32>
    tpu.vector_store %arg7[%c0_20, %c0_21], %32 {strides = array<i32>} : memref<1x128xf32, #tpu.memory_space<vmem>>, vector<1x128xf32>,
    return
  }
  func.func @transform_0(%arg0: i32) -> (i32, i32) {
    %c0_i32 = arith.constant 0 : i32
    %c0_i32_0 = arith.constant 0 : i32
    return %c0_i32, %arg0 : i32, i32
  }
  func.func @transform_1(%arg0: i32) -> (i32, i32) {
    %c0_i32 = arith.constant 0 : i32
    %c0_i32_0 = arith.constant 0 : i32
    %c0_i32_1 = arith.constant 0 : i32
    return %c0_i32, %c0_i32_0 : i32, i32
  }
  func.func @transform_2(%arg0: i32) -> (i32, i32) {
    %c0_i32 = arith.constant 0 : i32
    %c0_i32_0 = arith.constant 0 : i32
    %c0_i32_1 = arith.constant 0 : i32
    return %c0_i32, %c0_i32_0 : i32, i32
  }
  func.func @transform_3(%arg0: i32) -> (i32, i32) {
    %c0_i32 = arith.constant 0 : i32
    %c0_i32_0 = arith.constant 0 : i32
    %c0_i32_1 = arith.constant 0 : i32
    return %c0_i32, %c0_i32_0 : i32, i32
  }
  func.func @transform_4(%arg0: i32) -> (i32, i32) {
    %c0_i32 = arith.constant 0 : i32
    %c0_i32_0 = arith.constant 0 : i32
    %c0_i32_1 = arith.constant 0 : i32
    return %c0_i32, %c0_i32_0 : i32, i32
  }
  func.func @transform_5(%arg0: i32) -> (i32, i32) {
    %c0_i32 = arith.constant 0 : i32
    %c0_i32_0 = arith.constant 0 : i32
    %c0_i32_1 = arith.constant 0 : i32
    return %c0_i32, %c0_i32_0 : i32, i32
  }
  func.func @transform_6(%arg0: i32) -> (i32, i32) {
    %c0_i32 = arith.constant 0 : i32
    %c0_i32_0 = arith.constant 0 : i32
    return %c0_i32, %arg0 : i32, i32
  }
}

</mosaic_0001>

<bundles_post_ra>
// kernel: critic_forward.1
= control target key start
LH: loop header
LB: loop body
LE: loop exit
PB: predicated region body
PF: predicated region fallthrough
CT: control target
= control target key end

     0   :  { %v1379_v0 = vmov 0   ;;  %vm233_vm0 = vcmask 261120   ;;  %s1816_s5 = inlined_call_operand.vmem [shape: f32[449,1], index: 5, kind: input, shape index: {}]   ;;  %s1817_s0 = inlined_call_operand.vmem [shape: bf16[32,128], index: 0, kind: input, shape index: {}]   ;;  %s1818_s1 = inlined_call_operand.vmem [shape: bf16[128,32], index: 1, kind: input, shape index: {}]   ;;  %s1819_s4 = inlined_call_operand.vmem [shape: bf16[64,1], index: 4, kind: input, shape index: {}]   ;;  %s1820_s2 = inlined_call_operand.vmem [shape: bf16[256,128], index: 2, kind: input, shape index: {}]   ;;  %s1821_s3 = inlined_call_operand.vmem [shape: bf16[64,256], index: 3, kind: input, shape index: {}]   ;;  %s1822_s6 = inlined_call_operand.vmem [shape: f32[1,128], index: 6, kind: output, shape index: {}]  }
   0x1   :  { %1330 = vset.pattern.permute.xlu1 %v1379_v0  ;;  %1329 = vset.pattern.permute.xlu0 %v1379_v0  ;;  %v38_v1 = vld [vmem:[%s1816_s5 + $0x70] sm:$0xff]  ;;  %v36_v2 = vld [vmem:[%s1816_s5 + $0x60] sm:$0xff]  ;;  %v1341_v3 = vld [vmem:[%s1817_s0 + $0x8] sm:$0xff]  }
   0x2   :  { %173 = vperm.xlu0 %1329, %v38_v1   ;;  %163 = vperm.xlu1 %1330, %v36_v2   ;;  %v39_v4 = vld [vmem:[%s1816_s5 + $0x78] sm:$0xff]  ;;  %v37_v5 = vld [vmem:[%s1816_s5 + $0x68] sm:$0xff]  ;;  %v1342_v6 = vld [vmem:[%s1817_s0] sm:$0xff]  }
   0x3   :  { %1260 = vmatprep.subr.bf16.mxu0 %v1341_v3  ;;  %v1343_v7 = vld [vmem:[%s1818_s1] sm:$0xff]   ;;  %v35_v8 = vld [vmem:[%s1816_s5 + $0x58] sm:$0xff]  ;;  %v34_v9 = vld [vmem:[%s1816_s5 + $0x50] sm:$0xff] }
   0x4   :  { %1261 = vmatpush3.bf16.msra.mxu0 %v1341_v3  ;;  %1264 = vmatprep.mubr.msk.bf16.mxu0 %vm233_vm0, %v1343_v7  ;;  %v1344_v10 = vld [vmem:[%s1818_s1 + $0x8] sm:$0xff]   ;;  %v1345_v11 = vld [vmem:[%s1818_s1 + $0x10] sm:$0xff]   ;;  %v32_v13 = vld [vmem:[%s1816_s5 + $0x40] sm:$0xff] }
   0x5   :  { %1262 = vmatprep.subr.bf16.mxu0 %v1342_v6  ;;  %v33_v12 = vld [vmem:[%s1816_s5 + $0x48] sm:$0xff]  ;;  %v31_v14 = vld [vmem:[%s1816_s5 + $0x38] sm:$0xff]  ;;  %v30_v15 = vld [vmem:[%s1816_s5 + $0x30] sm:$0xff] }
   0x6   :  { %178 = vperm.xlu0 %1329, %v39_v4   ;;  %168 = vperm.xlu1 %1330, %v37_v5   ;;  %v1346_v16 = vld [vmem:[%s1818_s1 + $0x18] sm:$0xff]   ;;  %v1347_v17 = vld [vmem:[%s1818_s1 + $0x20] sm:$0xff]   ;;  %v29_v18 = vld [vmem:[%s1816_s5 + $0x28] sm:$0xff] }
   0x7   :  { %v28_v19 = vld [vmem:[%s1816_s5 + $0x20] sm:$0xff]  ;;  %v27_v20 = vld [vmem:[%s1816_s5 + $0x18] sm:$0xff]  ;;  %v26_v21 = vld [vmem:[%s1816_s5 + $0x10] sm:$0xff] }
   0x8   :  { %1263 = vmatpush3.bf16.msra.mxu0 %v1342_v6  ;;  %v1348_v22 = vld [vmem:[%s1818_s1 + $0x28] sm:$0xff]   ;;  %v1349_v23 = vld [vmem:[%s1818_s1 + $0x30] sm:$0xff]   ;;  %v24_v25 = vld [vmem:[%s1816_s5] sm:$0xff] }
   0x9   :  { %v25_v24 = vld [vmem:[%s1816_s5 + $0x8] sm:$0xff]  ;;  %v71_v26 = vld [vmem:[%s1816_s5 + $0x178] sm:$0xff]  ;;  %v70_v27 = vld [vmem:[%s1816_s5 + $0x170] sm:$0xff] }
   0xa   :  { %158 = vperm.xlu1 %1330, %v35_v8   ;;  %153 = vperm.xlu0 %1329, %v34_v9   ;;  %v1350_v28 = vld [vmem:[%s1818_s1 + $0x38] sm:$0xff]   ;;  %v54_v30 = vld [vmem:[%s1816_s5 + $0xf0] sm:$0xff]  ;;  %v69_v31 = vld [vmem:[%s1816_s5 + $0x168] sm:$0xff] }
   0xb   :  { %1265 = vmatmul.mubr.msk.bf16.vlgmr.msra.gmra.mxu0 %vm233_vm0, %v1344_v10  ;;  %v55_v29 = vld [vmem:[%s1816_s5 + $0xf8] sm:$0xff]  ;;  %v68_v32 = vld [vmem:[%s1816_s5 + $0x160] sm:$0xff]  ;;  %v53_v33 = vld [vmem:[%s1816_s5 + $0xe8] sm:$0xff] }
   0xc   :  { %1268 = vmatprep.mubr.msk.bf16.mxu0 %vm233_vm0, %v1345_v11  ;;  %v52_v34 = vld [vmem:[%s1816_s5 + $0xe0] sm:$0xff]  ;;  %v67_v35 = vld [vmem:[%s1816_s5 + $0x158] sm:$0xff]  ;;  %v66_v36 = vld [vmem:[%s1816_s5 + $0x150] sm:$0xff] }
   0xd   :  { %v51_v37 = vld [vmem:[%s1816_s5 + $0xd8] sm:$0xff]  ;;  %v50_v38 = vld [vmem:[%s1816_s5 + $0xd0] sm:$0xff]  ;;  %v65_v39 = vld [vmem:[%s1816_s5 + $0x148] sm:$0xff] }
   0xe   :  { %148 = vperm.xlu1 %1330, %v33_v12   ;;  %143 = vperm.xlu0 %1329, %v32_v13   ;;  %v64_v40 = vld [vmem:[%s1816_s5 + $0x140] sm:$0xff]  ;;  %v49_v41 = vld [vmem:[%s1816_s5 + $0xc8] sm:$0xff]  ;;  %v63_v43 = vld [vmem:[%s1816_s5 + $0x138] sm:$0xff] }
   0xf   :  { %v48_v42 = vld [vmem:[%s1816_s5 + $0xc0] sm:$0xff]  ;;  %v62_v44 = vld [vmem:[%s1816_s5 + $0x130] sm:$0xff]  ;;  %v47_v45 = vld [vmem:[%s1816_s5 + $0xb8] sm:$0xff] }
  0x10   :  { %v46_v46 = vld [vmem:[%s1816_s5 + $0xb0] sm:$0xff]  ;;  %v61_v47 = vld [vmem:[%s1816_s5 + $0x128] sm:$0xff]  ;;  %v60_v48 = vld [vmem:[%s1816_s5 + $0x120] sm:$0xff] }
  0x11   :  { %v45_v49 = vld [vmem:[%s1816_s5 + $0xa8] sm:$0xff]  ;;  %v44_v50 = vld [vmem:[%s1816_s5 + $0xa0] sm:$0xff]  ;;  %v59_v51 = vld [vmem:[%s1816_s5 + $0x118] sm:$0xff] }
  0x12   :  { %138 = vperm.xlu1 %1330, %v31_v14   ;;  %133 = vperm.xlu0 %1329, %v30_v15   ;;  %v58_v52 = vld [vmem:[%s1816_s5 + $0x110] sm:$0xff]  ;;  %v43_v53 = vld [vmem:[%s1816_s5 + $0x98] sm:$0xff]  ;;  %v57_v55 = vld [vmem:[%s1816_s5 + $0x108] sm:$0xff] }
  0x13   :  { %1269 = vmatmul.mubr.msk.bf16.gmra.mxu0 %vm233_vm0, %v1346_v16  ;;  %v42_v54 = vld [vmem:[%s1816_s5 + $0x90] sm:$0xff]  ;;  %v56_v56 = vld [vmem:[%s1816_s5 + $0x100] sm:$0xff]  ;;  %v41_v57 = vld [vmem:[%s1816_s5 + $0x88] sm:$0xff] }
  0x14   :  { %1272 = vmatprep.mubr.msk.bf16.mxu0 %vm233_vm0, %v1347_v17  ;;  %v40_v58 = vld [vmem:[%s1816_s5 + $0x80] sm:$0xff]  ;;  %v73_v59 = vld [vmem:[%s1816_s5 + $0x188] sm:$0xff]  ;;  %v75_v0 = vld [vmem:[%s1816_s5 + $0x198] sm:$0xff] }
  0x15   :  { %v72_v60 = vld [vmem:[%s1816_s5 + $0x180] sm:$0xff]  ;;  %v74_v1 = vld [vmem:[%s1816_s5 + $0x190] sm:$0xff]  ;;  %v1183_v2 = vld [vmem:[%s1819_s4 + $0x8] sm:$0xff]  }
  0x16   :  { %128 = vperm.xlu1 %1330, %v29_v18   ;;  %123 = vperm.xlu0 %1329, %v28_v19   ;;  %v1168_v61 = vld [vmem:[%s1819_s4] sm:$0xff]   ;;  %v1173_v4 = vunpack.c.l.bf16 %v1183_v2  ;;  %v1174_v5 = vunpack.c.h.bf16 %v1183_v2  ;;  %v77_v8 = vld [vmem:[%s1816_s5 + $0x1a8] sm:$0xff]  ;;  %v1184_v9 = vld [vmem:[%s1819_s4 + $0x10] sm:$0xff]  }
  0x17   :  { %v1169_v62 = vunpack.c.l.bf16 %v1168_v61  ;;  %v1170_v63 = vunpack.c.h.bf16 %v1168_v61  ;;  %v76_v6 = vld [vmem:[%s1816_s5 + $0x1a0] sm:$0xff]  ;;  %v1177_v10 = vunpack.c.l.bf16 %v1184_v9  ;;  %v78_v11 = vld [vmem:[%s1816_s5 + $0x1b0] sm:$0xff]  ;;  %v1178_v12 = vunpack.c.h.bf16 %v1184_v9  ;;  %v79_v13 = vld [vmem:[%s1816_s5 + $0x1b8] sm:$0xff] }
  0x18   :  { %v1336_v7 = vpack.i.bf16 %v1174_v5, %v1173_v4  ;;  %v1185_v14 = vld [vmem:[%s1819_s4 + $0x18] sm:$0xff]   ;;  %v80_v17 = vld [vmem:[%s1816_s5 + $0x1c0] sm:$0x1] }
  0x19   :  { %v1331_v3 = vpack.i.bf16 %v1170_v63, %v1169_v62  ;;  %v1182_v15 = vunpack.c.h.bf16 %v1185_v14  ;;  %v1181_v16 = vunpack.c.l.bf16 %v1185_v14  ;;  %v1351_v18 = vld [vmem:[%s1820_s2] sm:$0xff]  }
  0x1a   :  { %118 = vperm.xlu1 %1330, %v27_v20   ;;  %113 = vperm.xlu0 %1329, %v26_v21  }
  0x1b   :  { %1273 = vmatmul.mubr.msk.bf16.gmra.mxu0 %vm233_vm0, %v1348_v22  ;;  %1296 = vmatprep.mubr.bf16.mxu1 %v1351_v18 }
  0x1c   :  { %1276 = vmatprep.mubr.msk.bf16.mxu0 %vm233_vm0, %v1349_v23 }
  0x1e   :  { %108 = vperm.xlu1 %1330, %v25_v24   ;;  %103 = vperm.xlu0 %1329, %v24_v25  }
  0x22   :  { %568 = vperm.xlu1 %1330, %v71_v26   ;;  %563 = vperm.xlu0 %1329, %v70_v27  }
  0x23   :  { %1277 = vmatmul.mubr.msk.bf16.gmra.mxu0 %vm233_vm0, %v1350_v28 }
  0x26   :  { %488 = vperm.xlu1 %1330, %v55_v29   ;;  %483 = vperm.xlu0 %1329, %v54_v30  }
  0x2a   :  { %558 = vperm.xlu1 %1330, %v69_v31   ;;  %553 = vperm.xlu0 %1329, %v68_v32  }
  0x2e   :  { %478 = vperm.xlu1 %1330, %v53_v33   ;;  %473 = vperm.xlu0 %1329, %v52_v34  }
  0x32   :  { %548 = vperm.xlu1 %1330, %v67_v35   ;;  %543 = vperm.xlu0 %1329, %v66_v36  }
  0x36   :  { %468 = vperm.xlu1 %1330, %v51_v37   ;;  %463 = vperm.xlu0 %1329, %v50_v38  }
  0x3a   :  { %538 = vperm.xlu1 %1330, %v65_v39   ;;  %533 = vperm.xlu0 %1329, %v64_v40  }
  0x3e   :  { %458 = vperm.xlu1 %1330, %v49_v41   ;;  %453 = vperm.xlu0 %1329, %v48_v42  }
  0x42   :  { %528 = vperm.xlu1 %1330, %v63_v43   ;;  %523 = vperm.xlu0 %1329, %v62_v44  }
  0x46   :  { %448 = vperm.xlu1 %1330, %v47_v45   ;;  %443 = vperm.xlu0 %1329, %v46_v46  }
  0x4a   :  { %518 = vperm.xlu1 %1330, %v61_v47   ;;  %513 = vperm.xlu0 %1329, %v60_v48  }
  0x4e   :  { %438 = vperm.xlu1 %1330, %v45_v49   ;;  %433 = vperm.xlu0 %1329, %v44_v50  }
  0x52   :  { %508 = vperm.xlu1 %1330, %v59_v51   ;;  %503 = vperm.xlu0 %1329, %v58_v52  }
  0x56   :  { %428 = vperm.xlu1 %1330, %v43_v53   ;;  %423 = vperm.xlu0 %1329, %v42_v54  }
  0x5a   :  { %498 = vperm.xlu1 %1330, %v57_v55   ;;  %493 = vperm.xlu0 %1329, %v56_v56  }
  0x5e   :  { %418 = vperm.xlu1 %1330, %v41_v57   ;;  %413 = vperm.xlu0 %1329, %v40_v58  }
  0x62   :  { %891 = vperm.xlu1 %1330, %v73_v59   ;;  %886 = vperm.xlu0 %1329, %v72_v60  }
  0x66   :  { %901 = vperm.xlu1 %1330, %v75_v0   ;;  %896 = vperm.xlu0 %1329, %v74_v1  }
  0x6a   :  { %906 = vperm.xlu1 %1330, %v76_v6   ;;  %1332 = vperm.xlu0 %1329, %v1331_v3  }
  0x6e   :  { %911 = vperm.xlu1 %1330, %v77_v8   ;;  %1337 = vperm.xlu0 %1329, %v1336_v7  }
  0x72   :  { %1075 = vperm.xlu1 %1330, %v1177_v10   ;;  %916 = vperm.xlu0 %1329, %v78_v11  }
  0x76   :  { %1080 = vperm.xlu1 %1330, %v1178_v12   ;;  %921 = vperm.xlu0 %1329, %v79_v13  }
  0x7a   :  { %1090 = vperm.xlu1 %1330, %v1182_v15   ;;  %1085 = vperm.xlu0 %1329, %v1181_v16  }
  0x7d   :  { %v164_v23 = vpop.permute.xlu1 %163  ;;  %v174_v25 = vpop.permute.xlu0 %173 }
  0x7e   :  { %1116 = vperm.xlu0 %1329, %v80_v17  }
  0x81   :  { %v169_v28 = vpop.permute.xlu1 %168  ;;  %v179_v30 = vpop.permute.xlu0 %178 }
  0x85   :  { %v159_v33 = vpop.permute.xlu1 %158  ;;  %v154_v35 = vpop.permute.xlu0 %153 }
  0x89   :  { %v149_v38 = vpop.permute.xlu1 %148  ;;  %v144_v41 = vpop.permute.xlu0 %143 }
  0x8d   :  { %v139_v50 = vpop.permute.xlu1 %138  ;;  %v134_v55 = vpop.permute.xlu0 %133 }
  0x91   :  { %v129_v61 = vpop.permute.xlu1 %128  ;;  %v124_v1 = vpop.permute.xlu0 %123 }
  0x95   :  { %v119_v7 = vpop.permute.xlu1 %118  ;;  %v114_v10 = vpop.permute.xlu0 %113 }
  0x99   :  { %v109_v16 = vpop.permute.xlu1 %108 }
  0xcb   :  { %v1639_v19 = vpop.f32.mrf.mxu0 }
  0xcc   :  { %v301_v14 = vadd.f32 %v1639_v19, %v114_v10  ;;  %v1352_v19 = vld [vmem:[%s1820_s2 + $0x8] sm:$0xff]  }
  0xcd   :  { %v1641_v20 = vpop.f32.mrf.mxu0 }
  0xcf   :  { %v1267_v21 = vpop.f32.mrf.mxu0 }
  0xd0   :  { %v304_v11 = vadd.f32 %v1267_v21, %v119_v7 }
  0xd1   :  { %v1643_v22 = vpop.f32.mrf.mxu0 }
  0xd2   :  { %v358_v17 = vmax.f32 %v304_v11, 0.0  ;;  %v296_v18 = vadd.f32 %v1643_v22, %v109_v16  ;;  %v1353_v22 = vld [vmem:[%s1820_s2 + $0x10] sm:$0xff]  }
  0xd3   :  { %v1270_v24 = vpop.f32.mrf.mxu0 }
  0xd4   :  { %v317_v2 = vadd.f32 %v1270_v24, %v134_v55  ;;  %v104_v24 = vpop.permute.xlu0 %103  ;;  %v356_v21 = vmax.f32 %v296_v18, 0.0 }
  0xd5   :  { %v308_v26 = vpop.f32.mrf.mxu0 }
  0xd6   :  { %v361_v8 = vmax.f32 %v317_v2, 0.0  ;;  %v309_v9 = vadd.f32 %v308_v26, %v124_v1  ;;  %v293_v26 = vadd.f32 %v1641_v20, %v104_v24  ;;  %v1354_v20 = vld [vmem:[%s1820_s2 + $0x18] sm:$0xff]  }
  0xd7   :  { %v1271_v27 = vpop.f32.mrf.mxu0 }
  0xd8   :  { %v320_v62 = vadd.f32 %v1271_v27, %v139_v50  ;;  %v359_v15 = vmax.f32 %v309_v9, 0.0 }
  0xd9   :  { %v311_v29 = vpop.f32.mrf.mxu0 }
  0xda   :  { %v362_v4 = vmax.f32 %v320_v62, 0.0  ;;  %v312_v5 = vadd.f32 %v311_v29, %v129_v61  ;;  %v1369_v61 = vld [vmem:[%s1821_s3 + $0x4] ss:$8 sps:$4 sm:$0xff]  }
  0xdb   :  { %v1274_v31 = vpop.f32.mrf.mxu0  ;;  %996 = vmatprep.mubr.bf16.mxu0 %v1369_v61 }
  0xdc   :  { %v333_v51 = vadd.f32 %v1274_v31, %v154_v35  ;;  %v406_v12 = vpack.c.bf16 %v362_v4, %v361_v8  ;;  %v360_v13 = vmax.f32 %v312_v5, 0.0  ;;  %v1356_v31 = vld [vmem:[%s1820_s2 + $0x28] sm:$0xff]  }
  0xdd   :  { %v324_v32 = vpop.f32.mrf.mxu0  ;;  %v1360_v35 = vld [vmem:[%s1820_s2 + $0x48] sm:$0xff]  }
  0xde   :  { %v365_v59 = vmax.f32 %v333_v51, 0.0  ;;  %v325_v60 = vadd.f32 %v324_v32, %v144_v41  ;;  %v1357_v32 = vld [vmem:[%s1820_s2 + $0x30] sm:$0xff]   ;;  %v1366_v41 = vld [vmem:[%s1820_s2 + $0x78] sm:$0xff]  }
  0xdf   :  { %v1275_v34 = vpop.f32.mrf.mxu0 }
  0xe0   :  { %v336_v46 = vadd.f32 %v1275_v34, %v159_v33  ;;  %v363_v3 = vmax.f32 %v325_v60, 0.0  ;;  %v1358_v33 = vld [vmem:[%s1820_s2 + $0x38] sm:$0xff]   ;;  %v1359_v34 = vld [vmem:[%s1820_s2 + $0x40] sm:$0xff]  }
  0xe1   :  { %v327_v36 = vpop.f32.mrf.mxu0 }
  0xe2   :  { %v366_v56 = vmax.f32 %v336_v46, 0.0  ;;  %v328_v57 = vadd.f32 %v327_v36, %v149_v38  ;;  %v1361_v36 = vld [vmem:[%s1820_s2 + $0x50] sm:$0xff]   ;;  %v1363_v38 = vld [vmem:[%s1820_s2 + $0x60] sm:$0xff]  }
  0xe3   :  { %v1278_v37 = vpop.f32.mrf.mxu0 }
  0xe4   :  { %v349_v40 = vadd.f32 %v1278_v37, %v174_v25  ;;  %v408_v63 = vpack.c.bf16 %v366_v56, %v365_v59  ;;  %v364_v0 = vmax.f32 %v328_v57, 0.0  ;;  %v357_v25 = vmax.f32 %v301_v14, 0.0  ;;  %v1362_v37 = vld [vmem:[%s1820_s2 + $0x58] sm:$0xff]  }
  0xe5   :  { %v340_v39 = vpop.f32.mrf.mxu0 }
  0xe6   :  { %v341_v43 = vadd.f32 %v340_v39, %v164_v23  ;;  %v369_v47 = vmax.f32 %v349_v40, 0.0  ;;  %v407_v6 = vpack.c.bf16 %v364_v0, %v363_v3  ;;  %v405_v23 = vpack.c.bf16 %v360_v13, %v359_v15  ;;  %v1364_v39 = vld [vmem:[%s1820_s2 + $0x68] sm:$0xff]   ;;  %v1365_v40 = vld [vmem:[%s1820_s2 + $0x70] sm:$0xff]  }
  0xe7   :  { %v1279_v42 = vpop.f32.mrf.mxu0  ;;  %v404_v27 = vpack.c.bf16 %v358_v17, %v357_v25 }
  0xe8   :  { %v352_v44 = vadd.f32 %v1279_v42, %v179_v30  ;;  %v367_v52 = vmax.f32 %v341_v43, 0.0  ;;  %v1355_v30 = vld [vmem:[%s1820_s2 + $0x20] sm:$0xff]   ;;  %v1693_v42 = vpop.permute.xlu0 %563  ;;  %v1695_v43 = vpop.permute.xlu1 %568 }
  0xe9   :  { %v343_v45 = vpop.f32.mrf.mxu0 }
  0xea   :  { %v370_v48 = vmax.f32 %v352_v44, 0.0  ;;  %v344_v49 = vadd.f32 %v343_v45, %v169_v28  ;;  %v355_v28 = vmax.f32 %v293_v26, 0.0 }
  0xec   :  { %v368_v53 = vmax.f32 %v344_v49, 0.0  ;;  %v410_v54 = vpack.c.bf16 %v370_v48, %v369_v47  ;;  %v403_v29 = vpack.c.bf16 %v356_v21, %v355_v28  ;;  %v1697_v44 = vpop.permute.xlu0 %483  ;;  %v1699_v45 = vpop.permute.xlu1 %488 }
  0xee   :  { %v409_v58 = vpack.c.bf16 %v368_v53, %v367_v52  ;;  %1280 = vmatprep.subr.bf16.mxu1 %v410_v54 }
  0xef   :  { %1281 = vmatpush3.bf16.msra.mxu1 %v410_v54 }
  0xf0   :  { %1282 = vmatprep.subr.bf16.mxu1 %v409_v58  ;;  %v1701_v46 = vpop.permute.xlu0 %553  ;;  %v1703_v47 = vpop.permute.xlu1 %558 }
  0xf3   :  { %1283 = vmatpush3.bf16.msra.mxu1 %v409_v58 }
  0xf4   :  { %1284 = vmatprep.subr.bf16.mxu1 %v408_v63  ;;  %v1705_v48 = vpop.permute.xlu0 %473  ;;  %v1707_v49 = vpop.permute.xlu1 %478 }
  0xf7   :  { %1285 = vmatpush3.bf16.msra.mxu1 %v408_v63 }
  0xf8   :  { %1286 = vmatprep.subr.bf16.mxu1 %v407_v6  ;;  %v1709_v50 = vpop.permute.xlu0 %543  ;;  %v1711_v51 = vpop.permute.xlu1 %548 }
  0xfb   :  { %1287 = vmatpush3.bf16.msra.mxu1 %v407_v6 }
  0xfc   :  { %1288 = vmatprep.subr.bf16.mxu1 %v406_v12  ;;  %v1713_v52 = vpop.permute.xlu0 %463  ;;  %v1715_v53 = vpop.permute.xlu1 %468 }
  0xff   :  { %1289 = vmatpush3.bf16.msra.mxu1 %v406_v12 }
 0x100   :  { %1290 = vmatprep.subr.bf16.mxu1 %v405_v23  ;;  %v1717_v54 = vpop.permute.xlu0 %533  ;;  %v1719_v55 = vpop.permute.xlu1 %538 }
 0x103   :  { %1291 = vmatpush3.bf16.msra.mxu1 %v405_v23 }
 0x104   :  { %1292 = vmatprep.subr.bf16.mxu1 %v404_v27  ;;  %v1721_v56 = vpop.permute.xlu0 %453  ;;  %v1723_v57 = vpop.permute.xlu1 %458 }
 0x107   :  { %1293 = vmatpush3.bf16.msra.mxu1 %v404_v27 }
 0x108   :  { %1294 = vmatprep.subr.bf16.mxu1 %v403_v29  ;;  %v1725_v58 = vpop.permute.xlu0 %523  ;;  %v1727_v59 = vpop.permute.xlu1 %528 }
 0x10b   :  { %1295 = vmatpush3.bf16.msra.mxu1 %v403_v29 }
 0x10c   :  { %v444_v60 = vpop.permute.xlu0 %443  ;;  %v449_v62 = vpop.permute.xlu1 %448 }
 0x10e   :  { %1297 = vmatmul.mubr.bf16.vlgmr.msra.gmra.mxu1 %v1352_v19 }
 0x10f   :  { %1300 = vmatprep.mubr.bf16.mxu1 %v1353_v22 }
 0x110   :  { %v1732_v63 = vpop.permute.xlu0 %513  ;;  %v1734_v0 = vpop.permute.xlu1 %518 }
 0x114   :  { %v434_v1 = vpop.permute.xlu0 %433  ;;  %v439_v2 = vpop.permute.xlu1 %438 }
 0x116   :  { %1301 = vmatmul.mubr.bf16.gmra.mxu1 %v1354_v20 }
 0x117   :  { %1304 = vmatprep.mubr.bf16.mxu1 %v1355_v30 }
 0x118   :  { %v1736_v3 = vpop.permute.xlu0 %503  ;;  %v1738_v4 = vpop.permute.xlu1 %508 }
 0x11c   :  { %v424_v5 = vpop.permute.xlu0 %423  ;;  %v429_v6 = vpop.permute.xlu1 %428 }
 0x11e   :  { %1305 = vmatmul.mubr.bf16.gmra.mxu1 %v1356_v31 }
 0x11f   :  { %1308 = vmatprep.mubr.bf16.mxu1 %v1357_v32 }
 0x120   :  { %v1740_v7 = vpop.permute.xlu0 %493  ;;  %v1742_v8 = vpop.permute.xlu1 %498 }
 0x124   :  { %v414_v12 = vpop.permute.xlu0 %413  ;;  %v419_v16 = vpop.permute.xlu1 %418 }
 0x126   :  { %1309 = vmatmul.mubr.bf16.gmra.mxu1 %v1358_v33 }
 0x127   :  { %1312 = vmatprep.mubr.bf16.mxu1 %v1359_v34 }
 0x12e   :  { %1313 = vmatmul.mubr.bf16.gmra.mxu1 %v1360_v35 }
 0x12f   :  { %1316 = vmatprep.mubr.bf16.mxu1 %v1361_v36 }
 0x136   :  { %1317 = vmatmul.mubr.bf16.gmra.mxu1 %v1362_v37 }
 0x137   :  { %1320 = vmatprep.mubr.bf16.mxu1 %v1363_v38 }
 0x13e   :  { %1321 = vmatmul.mubr.bf16.gmra.mxu1 %v1364_v39 }
 0x13f   :  { %1324 = vmatprep.mubr.bf16.mxu1 %v1365_v40 }
 0x146   :  { %1325 = vmatmul.mubr.bf16.gmra.mxu1 %v1366_v41 }
 0x1ce   :  { %v1298_v9 = vpop.f32.mrf.mxu1 }
 0x1cf   :  { %v710_v11 = vadd.f32 %v1298_v9, %v424_v5 }
 0x1d0   :  { %v701_v10 = vpop.f32.mrf.mxu1 }
 0x1d1   :  { %v702_v14 = vadd.f32 %v701_v10, %v414_v12  ;;  %v830_v18 = vmax.f32 %v710_v11, 0.0 }
 0x1d2   :  { %v1299_v13 = vpop.f32.mrf.mxu1 }
 0x1d3   :  { %v713_v15 = vadd.f32 %v1299_v13, %v429_v6  ;;  %v828_v26 = vmax.f32 %v702_v14, 0.0 }
 0x1d4   :  { %v704_v17 = vpop.f32.mrf.mxu1 }
 0x1d5   :  { %v831_v23 = vmax.f32 %v713_v15, 0.0  ;;  %v705_v24 = vadd.f32 %v704_v17, %v419_v16 }
 0x1d6   :  { %v1302_v25 = vpop.f32.mrf.mxu1 }
 0x1d7   :  { %v1744_v27 = vpack.c.bf16 %v831_v23, %v830_v18  ;;  %v829_v21 = vmax.f32 %v705_v24, 0.0  ;;  %v726_v19 = vadd.f32 %v1302_v25, %v444_v60 }
 0x1d8   :  { %v717_v28 = vpop.f32.mrf.mxu1 }
 0x1d9   :  { %v1746_v29 = vpack.c.bf16 %v829_v21, %v828_v26  ;;  %v718_v20 = vadd.f32 %v717_v28, %v434_v1  ;;  %v834_v32 = vmax.f32 %v726_v19, 0.0 }
 0x1da   :  { %v1303_v22 = vpop.f32.mrf.mxu1 }
 0x1db   :  { %v729_v30 = vadd.f32 %v1303_v22, %v449_v62  ;;  %v832_v36 = vmax.f32 %v718_v20, 0.0 }
 0x1dc   :  { %v720_v31 = vpop.f32.mrf.mxu1 }
 0x1dd   :  { %v835_v33 = vmax.f32 %v729_v30, 0.0  ;;  %v721_v34 = vadd.f32 %v720_v31, %v439_v2 }
 0x1de   :  { %v1306_v35 = vpop.f32.mrf.mxu1 }
 0x1df   :  { %v1748_v37 = vpack.c.bf16 %v835_v33, %v834_v32  ;;  %v833_v38 = vmax.f32 %v721_v34, 0.0 }
 0x1e0   :  { %v733_v39 = vpop.f32.mrf.mxu1 }
 0x1e1   :  { %v1750_v40 = vpack.c.bf16 %v833_v38, %v832_v36 }
 0x1e2   :  { %v1307_v41 = vpop.f32.mrf.mxu1 }
 0x1e4   :  { %v736_v61 = vpop.f32.mrf.mxu1 }
 0x1e6   :  { %v1310_v5 = vpop.f32.mrf.mxu1 }
 0x1e7   :  { %v758_v21 = vadd.f32 %v1310_v5, %v1697_v44 }
 0x1e8   :  { %v749_v6 = vpop.f32.mrf.mxu1 }
 0x1e9   :  { %v842_v36 = vmax.f32 %v758_v21, 0.0 }
 0x1ea   :  { %v1311_v60 = vpop.f32.mrf.mxu1 }
 0x1eb   :  { %v761_v24 = vadd.f32 %v1311_v60, %v1699_v45 }
 0x1ec   :  { %v752_v9 = vpop.f32.mrf.mxu1 }
 0x1ed   :  { %v843_v20 = vmax.f32 %v761_v24, 0.0  ;;  %v753_v30 = vadd.f32 %v752_v9, %v1707_v49 }
 0x1ee   :  { %v1752_v1 = vpop.f32.mrf.mxu1 }
 0x1ef   :  { %v875_v60 = vpack.c.bf16 %v843_v20, %v842_v36 }
 0x1f0   :  { %v1754_v62 = vpop.f32.mrf.mxu1 }
 0x1f2   :  { %v1756_v10 = vpop.f32.mrf.mxu1 }
 0x1f4   :  { %v1758_v2 = vpop.f32.mrf.mxu1 }
 0x1f6   :  { %v1318_v11 = vpop.f32.mrf.mxu1 }
 0x1f8   :  { %v781_v12 = vpop.f32.mrf.mxu1 }
 0x1fa   :  { %v1319_v13 = vpop.f32.mrf.mxu1 }
 0x1fc   :  { %v784_v14 = vpop.f32.mrf.mxu1 }
 0x1fe   :  { %v1322_v15 = vpop.f32.mrf.mxu1 }
 0x1ff   :  { %v806_v44 = vadd.f32 %v1322_v15, %v1709_v50 }
 0x200   :  { %v797_v16 = vpop.f32.mrf.mxu1 }
 0x201   :  { %v854_v24 = vmax.f32 %v806_v44, 0.0 }
 0x202   :  { %v1323_v17 = vpop.f32.mrf.mxu1 }
 0x203   :  { %v809_v32 = vadd.f32 %v1323_v17, %v1711_v51  ;;  %v742_v17 = vadd.f32 %v1306_v35, %v1713_v52  ;;  %v790_v52 = vadd.f32 %v1318_v11, %v1725_v58  ;;  %v774_v11 = vadd.f32 %v1752_v1, %v1736_v3  ;;  %v1378_v1 = vld [vmem:[%s1821_s3 + $0x30] ss:$8 sps:$4 sm:$0xff]  }
 0x204   :  { %v800_v18 = vpop.f32.mrf.mxu1 }
 0x205   :  { %v855_v49 = vmax.f32 %v809_v32, 0.0  ;;  %v801_v9 = vadd.f32 %v800_v18, %v1719_v55  ;;  %v734_v55 = vadd.f32 %v733_v39, %v1721_v56  ;;  %v777_v56 = vadd.f32 %v1756_v10, %v1738_v4 }
 0x206   :  { %v1326_v23 = vpop.f32.mrf.mxu1 }
 0x207   :  { %v822_v26 = vadd.f32 %v1326_v23, %v1693_v42  ;;  %v750_v42 = vadd.f32 %v749_v6, %v1705_v48  ;;  %v841_v23 = vmax.f32 %v753_v30, 0.0  ;;  %v798_v48 = vadd.f32 %v797_v16, %v1717_v54 }
 0x208   :  { %v813_v25 = vpop.f32.mrf.mxu1  ;;  %v737_v6 = vadd.f32 %v736_v61, %v1723_v57  ;;  %v785_v16 = vadd.f32 %v784_v14, %v1734_v0  ;;  %v836_v57 = vmax.f32 %v734_v55, 0.0  ;;  %v850_v61 = vmax.f32 %v790_v52, 0.0 }
 0x209   :  { %v814_v19 = vadd.f32 %v813_v25, %v1701_v46  ;;  %v858_v33 = vmax.f32 %v822_v26, 0.0  ;;  %v853_v25 = vmax.f32 %v801_v9, 0.0  ;;  %v838_v26 = vmax.f32 %v742_v17, 0.0 }
 0x20a   :  { %v1327_v28 = vpop.f32.mrf.mxu1  ;;  %v852_v35 = vmax.f32 %v798_v48, 0.0  ;;  %v837_v21 = vmax.f32 %v737_v6, 0.0  ;;  %v849_v58 = vmax.f32 %v785_v16, 0.0  ;;  %v847_v0 = vmax.f32 %v777_v56, 0.0 }
 0x20b   :  { %v825_v22 = vadd.f32 %v1327_v28, %v1695_v43  ;;  %v856_v38 = vmax.f32 %v814_v19, 0.0  ;;  %v745_v43 = vadd.f32 %v1307_v41, %v1715_v53  ;;  %v793_v53 = vadd.f32 %v1319_v13, %v1727_v59 }
 0x20c   :  { %v816_v31 = vpop.f32.mrf.mxu1  ;;  %v881_v41 = vpack.c.bf16 %v855_v49, %v854_v24  ;;  %v880_v28 = vpack.c.bf16 %v853_v25, %v852_v35  ;;  %v782_v59 = vadd.f32 %v781_v12, %v1732_v63  ;;  %v872_v13 = vpack.c.bf16 %v837_v21, %v836_v57 }
 0x20d   :  { %v859_v34 = vmax.f32 %v825_v22, 0.0  ;;  %v817_v45 = vadd.f32 %v816_v31, %v1703_v47  ;;  %v840_v47 = vmax.f32 %v750_v42, 0.0  ;;  %v839_v50 = vmax.f32 %v745_v43, 0.0 }
 0x20e   :  { %v851_v54 = vmax.f32 %v793_v53, 0.0  ;;  %v848_v19 = vmax.f32 %v782_v59, 0.0  ;;  %v769_v14 = vadd.f32 %v1758_v2, %v1742_v8  ;;  %v846_v63 = vmax.f32 %v774_v11, 0.0  ;;  %v1367_v8 = vld [vmem:[%s1821_s3] ss:$8 sps:$4 sm:$0xff]   ;;  %v892_v2 = vpop.permute.xlu1 %891 }
 0x20f   :  { %v883_v5 = vpack.c.bf16 %v859_v34, %v858_v33  ;;  %v857_v46 = vmax.f32 %v817_v45, 0.0  ;;  %v874_v15 = vpack.c.bf16 %v841_v23, %v840_v47  ;;  %v873_v18 = vpack.c.bf16 %v839_v50, %v838_v26 }
 0x210   :  { %v879_v39 = vpack.c.bf16 %v851_v54, %v850_v61  ;;  %v878_v22 = vpack.c.bf16 %v849_v58, %v848_v19  ;;  %v766_v12 = vadd.f32 %v1754_v62, %v1740_v7  ;;  %v877_v4 = vpack.c.bf16 %v847_v0, %v846_v63  ;;  %v1370_v7 = vld [vmem:[%s1821_s3 + $0x14] ss:$8 sps:$4 sm:$0xff]   ;;  %v887_v62 = vpop.permute.xlu0 %886 }
 0x211   :  { %v882_v51 = vpack.c.bf16 %v857_v46, %v856_v38  ;;  %1220 = vmatprep.subr.bf16.mxu0 %v883_v5  ;;  %v845_v10 = vmax.f32 %v769_v14, 0.0 }
 0x212   :  { %1221 = vmatpush3.bf16.msra.mxu0 %v875_v60  ;;  %v844_v20 = vmax.f32 %v766_v12, 0.0  ;;  %v902_v34 = vpop.permute.xlu1 %901 }
 0x213   :  { %1222 = vmatprep.subr.bf16.mxu0 %v882_v51 }
 0x214   :  { %v876_v3 = vpack.c.bf16 %v845_v10, %v844_v20  ;;  %v897_v31 = vpop.permute.xlu0 %896 }
 0x216   :  { %1223 = vmatpush3.bf16.msra.mxu0 %v874_v15  ;;  %v907_v5 = vpop.permute.xlu1 %906 }
 0x217   :  { %1224 = vmatprep.subr.bf16.mxu0 %v881_v41 }
 0x218   :  { %v1333_v36 = vpop.permute.xlu0 %1332 }
 0x219   :  { %v1335_v26 = vunpack.i.h.bf16 %v1333_v36 }
 0x21a   :  { %1225 = vmatpush3.bf16.msra.mxu0 %v873_v18  ;;  %v912_v48 = vpop.permute.xlu1 %911  ;;  %v1334_v18 = vunpack.i.l.bf16 %v1333_v36 }
 0x21b   :  { %1226 = vmatprep.subr.bf16.mxu0 %v880_v28 }
 0x21c   :  { %v1338_v23 = vpop.permute.xlu0 %1337 }
 0x21d   :  { %v1339_v54 = vunpack.i.l.bf16 %v1338_v23  ;;  %v1340_v61 = vunpack.i.h.bf16 %v1338_v23 }
 0x21e   :  { %1227 = vmatpush3.bf16.msra.mxu0 %v872_v13  ;;  %v1076_v59 = vpop.permute.xlu1 %1075 }
 0x21f   :  { %1228 = vmatprep.subr.bf16.mxu0 %v879_v39 }
 0x220   :  { %v917_v41 = vpop.permute.xlu0 %916 }
 0x222   :  { %1229 = vmatpush3.bf16.msra.mxu0 %v1748_v37  ;;  %v1372_v37 = vld [vmem:[%s1821_s3 + $0x10] ss:$8 sps:$4 sm:$0xff]  }
 0x223   :  { %1230 = vmatprep.subr.bf16.mxu0 %v878_v22 }
 0x224   :  { %v922_v19 = vpop.permute.xlu0 %921 }
 0x226   :  { %1231 = vmatpush3.bf16.msra.mxu0 %v1750_v40  ;;  %v1376_v40 = vld [vmem:[%s1821_s3 + $0x34] ss:$8 sps:$4 sm:$0xff]  }
 0x227   :  { %1232 = vmatprep.subr.bf16.mxu0 %v877_v4 }
 0x22a   :  { %1233 = vmatpush3.bf16.msra.mxu0 %v1744_v27  ;;  %v1373_v27 = vld [vmem:[%s1821_s3 + $0x24] ss:$8 sps:$4 sm:$0xff]  }
 0x22b   :  { %1234 = vmatprep.subr.bf16.mxu0 %v876_v3 }
 0x22e   :  { %1235 = vmatpush3.bf16.msra.mxu0 %v1746_v29  ;;  %v1375_v29 = vld [vmem:[%s1821_s3 + $0x20] ss:$8 sps:$4 sm:$0xff]  }
 0x231   :  { %997 = vmatmul.mubr.bf16.vlgmr.msra.gmra.mxu0 %v1367_v8  ;;  %v1081_v8 = vpop.permute.xlu1 %1080 }
 0x232   :  { %1004 = vmatprep.mubr.bf16.mxu0 %v1370_v7 }
 0x239   :  { %1005 = vmatmul.mubr.bf16.gmra.mxu0 %v1372_v37 }
 0x23a   :  { %1012 = vmatprep.mubr.bf16.mxu0 %v1373_v27 }
 0x241   :  { %1013 = vmatmul.mubr.bf16.gmra.mxu0 %v1375_v29 }
 0x242   :  { %1020 = vmatprep.mubr.bf16.mxu0 %v1376_v40 }
 0x249   :  { %1021 = vmatmul.mubr.bf16.gmra.mxu0 %v1378_v1  ;;  %v1086_v1 = vpop.permute.xlu0 %1085 }
 0x2f1   :  { %v1236_v30 = vpop.f32.mrf.mxu0 }
 0x2f3   :  { %v1237_v32 = vpop.f32.mrf.mxu0 }
 0x2f4   :  { %v1238_v43 = vadd.f32 %v1237_v32, %v1236_v30 }
 0x2f5   :  { %v1239_v33 = vpop.f32.mrf.mxu0 }
 0x2f6   :  { %v999_v47 = vadd.f32 %v1238_v43, %v887_v62 }
 0x2f7   :  { %v1240_v45 = vpop.f32.mrf.mxu0 }
 0x2f8   :  { %v1241_v38 = vadd.f32 %v1240_v45, %v1239_v33  ;;  %v1029_v55 = vmax.f32 %v999_v47, 0.0  ;;  %v1091_v33 = vpop.permute.xlu1 %1090 }
 0x2f9   :  { %v1242_v42 = vpop.f32.mrf.mxu0 }
 0x2fa   :  { %v1002_v9 = vadd.f32 %v1241_v38, %v892_v2  ;;  %v1093_v56 = vmul.f32 %v1334_v18, %v1029_v55 }
 0x2fb   :  { %v1243_v44 = vpop.f32.mrf.mxu0 }
 0x2fc   :  { %v1244_v60 = vadd.f32 %v1243_v44, %v1242_v42  ;;  %v1030_v6 = vmax.f32 %v1002_v9, 0.0 }
 0x2fd   :  { %v1245_v46 = vpop.f32.mrf.mxu0 }
 0x2fe   :  { %v1007_v24 = vadd.f32 %v1244_v60, %v897_v31  ;;  %v1094_v16 = vmul.f32 %v1335_v26, %v1030_v6  ;;  %v1117_v60 = vpop.permute.xlu0 %1116 }
 0x2ff   :  { %v1246_v49 = vpop.f32.mrf.mxu0 }
 0x300   :  { %v1247_v51 = vadd.f32 %v1246_v49, %v1245_v46  ;;  %v1031_v52 = vmax.f32 %v1007_v24, 0.0  ;;  %v1101_v14 = vadd.f32 %v1094_v16, %v1093_v56 }
 0x301   :  { %v1248_v17 = vpop.f32.mrf.mxu0 }
 0x302   :  { %v1010_v15 = vadd.f32 %v1247_v51, %v902_v34  ;;  %v1095_v39 = vmul.f32 %v1339_v54, %v1031_v52 }
 0x303   :  { %v1249_v50 = vpop.f32.mrf.mxu0 }
 0x304   :  { %v1250_v53 = vadd.f32 %v1249_v50, %v1248_v17  ;;  %v1032_v28 = vmax.f32 %v1010_v15, 0.0  ;;  %v1102_v10 = vadd.f32 %v1101_v14, %v1095_v39 }
 0x305   :  { %v1251_v25 = vpop.f32.mrf.mxu0 }
 0x306   :  { %v1015_v35 = vadd.f32 %v1250_v53, %v907_v5  ;;  %v1096_v22 = vmul.f32 %v1340_v61, %v1032_v28 }
 0x307   :  { %v1252_v21 = vpop.f32.mrf.mxu0 }
 0x308   :  { %v1253_v57 = vadd.f32 %v1252_v21, %v1251_v25  ;;  %v1033_v58 = vmax.f32 %v1015_v35, 0.0  ;;  %v1103_v37 = vadd.f32 %v1102_v10, %v1096_v22 }
 0x309   :  { %v1254_v13 = vpop.f32.mrf.mxu0 }
 0x30a   :  { %v1018_v11 = vadd.f32 %v1253_v57, %v912_v48  ;;  %v1097_v20 = vmul.f32 %v1076_v59, %v1033_v58 }
 0x30b   :  { %v1255_v0 = vpop.f32.mrf.mxu0 }
 0x30c   :  { %v1034_v63 = vmax.f32 %v1018_v11, 0.0  ;;  %v1256_v12 = vadd.f32 %v1255_v0, %v1254_v13  ;;  %v1104_v62 = vadd.f32 %v1103_v37, %v1097_v20 }
 0x30d   :  { %v1257_v4 = vpop.f32.mrf.mxu0 }
 0x30e   :  { %v1023_v3 = vadd.f32 %v1256_v12, %v917_v41  ;;  %v1098_v27 = vmul.f32 %v1081_v8, %v1034_v63 }
 0x30f   :  { %v1258_v7 = vpop.f32.mrf.mxu0 }
 0x310   :  { %v1035_v29 = vmax.f32 %v1023_v3, 0.0  ;;  %v1259_v40 = vadd.f32 %v1258_v7, %v1257_v4  ;;  %v1105_v31 = vadd.f32 %v1104_v62, %v1098_v27 }
 0x312   :  { %v1099_v2 = vmul.f32 %v1086_v1, %v1035_v29  ;;  %v1026_v30 = vadd.f32 %v1259_v40, %v922_v19 }
 0x314   :  { %v1036_v32 = vmax.f32 %v1026_v30, 0.0  ;;  %v1106_v34 = vadd.f32 %v1105_v31, %v1099_v2 }
 0x316   :  { %v1100_v45 = vmul.f32 %v1091_v33, %v1036_v32 }
 0x318   :  { %v1107_v36 = vadd.f32 %v1106_v34, %v1100_v45 }
 0x31a   :  { %v1108_v42 = vrot.slane %v1107_v36, 4 }
 0x31c   :  { %v1109_v44 = vadd.f32 %v1108_v42, %v1107_v36 }
 0x31e   :  { %v1110_v38 = vrot.slane %v1109_v44, 2 }
 0x320   :  { %v1111_v5 = vadd.f32 %v1110_v38, %v1109_v44 }
 0x322   :  { %v1112_v46 = vrot.slane %v1111_v5, 1 }
 0x324   :  { %v1113_v43 = vadd.f32 %v1112_v46, %v1111_v5 }
 0x326   :  { %v1119_v23 = vadd.f32 %v1117_v60, %v1113_v43 }
 0x328   :  { %1120 = vst [vmem:[%s1822_s6] sm:$0x1] %v1119_v23 }

</bundles_post_ra>
